<compile_context>
chip_gen: v7x
topology: tpu7x:2x2x1
jax: 0.10.0
libtpu: 0.0.40
codegen_flags: <defaults>
</compile_context>

<pallas_src>
import functools

import jax
import jax.numpy as jnp
from jax.experimental import pallas as pl
from jax.experimental.pallas import tpu as pltpu

_SUBLANE = 8       # f32 sublane granule
_LANE = 128        # lane granule
_ROW_TILE_CAP = 256    # sublane-axis tile cap
_COL_TILE_CAP = 512    # lane-axis tile cap (multiple of 128)


def _chomp_copy_kernel(x_ref, o_ref):
    # Copy the leading Tout columns of this tile.  When the time axis is tiled
    # (Tout > 128) the input and output blocks have identical shapes and this
    # is a straight, unmasked full-tile copy; otherwise it statically slices
    # off the chomped tail of the single full-width block.
    o_ref[...] = x_ref[:, : o_ref.shape[-1]]


def _pick_row_tile(rows: int) -> int:
    """Sublane-axis tile: multiple of 8, capped, >=2 grid steps when possible."""
    if rows <= _SUBLANE:
        return rows                                     # full-dim block
    tile = min(rows - rows % _SUBLANE, _ROW_TILE_CAP)
    # Prefer >= 2 grid steps so v7x's two TensorCores both get work under
    # dimension_semantics=("parallel", "parallel").
    while tile > _SUBLANE and pl.cdiv(rows, tile) < 2:
        half = tile // 2
        tile = max(_SUBLANE, half - half % _SUBLANE)
    return tile


def _pick_col_tile(t_out: int) -> int:
    """Lane-axis tile: multiple of 128 when the output is wide enough."""
    if t_out <= _LANE:
        return t_out                                    # single full-dim block
    return min(t_out - t_out % _LANE, _COL_TILE_CAP)


def chomp1d(x, chomp_size: int):
    """Chomp1d.forward: x[:, :, :-chomp_size] for x of shape (B, C, T)."""
    assert isinstance(chomp_size, int) and chomp_size >= 1, chomp_size
    B, C, T = x.shape
    assert chomp_size < T, (chomp_size, T)
    t_out = T - chomp_size
    rows = B * C

    # Fold batch and channels into the sublane axis (free, contiguous reshape)
    # so each grid step moves a large lane-dense slab.
    x2 = x.reshape(rows, T)

    row_tile = _pick_row_tile(rows)
    col_tile = _pick_col_tile(t_out)
    # If the time axis is tiled, input blocks use the same 128-aligned tile
    # (full-tile copy in the kernel); otherwise the input block spans the full
    # T and the kernel slices off the chomped tail (== the Chomp).
    in_t_block = col_tile if t_out > _LANE else T

    grid = (pl.cdiv(rows, row_tile), pl.cdiv(t_out, col_tile))

    out2 = pl.pallas_call(
        _chomp_copy_kernel,
        out_shape=jax.ShapeDtypeStruct((rows, t_out), x.dtype),
        grid=grid,
        in_specs=[pl.BlockSpec((row_tile, in_t_block), lambda r, c: (r, c))],
        out_specs=pl.BlockSpec((row_tile, col_tile), lambda r, c: (r, c)),
        compiler_params=pltpu.CompilerParams(
            dimension_semantics=("parallel", "parallel")),
    )(x2)
    return out2.reshape(B, C, t_out)


if __name__ == "__main__":
    root = jax.random.PRNGKey(0)
    k_small, k_large = jax.random.split(root)

    # Small shape consistent with the module's use in CausalCNN:
    # Conv1d(padding=(K-1)*d) followed by Chomp1d(chomp_size=(K-1)*d).
    B, C, T, chomp = 2, 4, 16, 2
    x = jax.random.normal(k_small, (B, C, T), jnp.float32)
    f = jax.jit(functools.partial(chomp1d, chomp_size=chomp))
    out = jax.block_until_ready(f(x))
    assert out.shape == (B, C, T - chomp), out.shape
    assert jnp.array_equal(out, x[:, :, :-chomp])

    # Slightly larger case exercising the lane-dense, multi-step grid path
    # (rows=128 -> two 64-row tiles; Tout=1024 -> two 512-wide column tiles).
    B2, C2, T2, chomp2 = 4, 32, 1032, 8
    x2 = jax.random.normal(k_large, (B2, C2, T2), jnp.float32)
    f2 = jax.jit(functools.partial(chomp1d, chomp_size=chomp2))
    out2 = jax.block_until_ready(f2(x2))
    assert out2.shape == (B2, C2, T2 - chomp2), out2.shape
    assert jnp.array_equal(out2, x2[:, :, :-chomp2])

    print("KERNEL_OK")
</pallas_src>

<mosaic_0001>
module attributes {stable_mosaic.version = 11 : i64} {
  func.func @_chomp_copy_kernel(%arg0: i32, %arg1: i32, %arg2: memref<8x16xf32, #tpu.memory_space<vmem>>, %arg3: memref<8x14xf32, #tpu.memory_space<vmem>>) attributes {dimension_semantics = [#tpu.dimension_semantics<parallel>, #tpu.dimension_semantics<parallel>], iteration_bounds = array<i64: 1, 1>, scalar_prefetch = 0 : i64, scratch_operands = 0 : i64, tpu.core_type = #tpu.core_type<tc>, window_params = [{transform_indices = @transform_0, window_bounds = array<i64: 8, 16>}, {transform_indices = @transform_1, window_bounds = array<i64: 8, 14>}]} {
    %c0 = arith.constant 0 : index
    %c0_0 = arith.constant 0 : index
    %0 = vector.load %arg2[%c0, %c0_0] : memref<8x16xf32, #tpu.memory_space<vmem>>, vector<8x14xf32>
    %c0_1 = arith.constant 0 : index
    %c0_2 = arith.constant 0 : index
    %1 = vector.load %arg3[%c0_1, %c0_2] : memref<8x14xf32, #tpu.memory_space<vmem>>, vector<8x14xf32>
    tpu.vector_store %arg3[%c0_1, %c0_2], %0 {strides = array<i32>} : memref<8x14xf32, #tpu.memory_space<vmem>>, vector<8x14xf32>,
    return
  }
  func.func @transform_0(%arg0: i32, %arg1: i32) -> (i32, i32) {
    %c0_i32 = arith.constant 0 : i32
    return %arg0, %arg1 : i32, i32
  }
  func.func @transform_1(%arg0: i32, %arg1: i32) -> (i32, i32) {
    %c0_i32 = arith.constant 0 : i32
    return %arg0, %arg1 : i32, i32
  }
}

</mosaic_0001>

<bundles_post_ra>
// kernel: chomp1d.1
= control target key start
LH: loop header
LB: loop body
LE: loop exit
PB: predicated region body
PF: predicated region fallthrough
CT: control target
= control target key end

     0   :  { %6 = vsyncpa [#allocation3], 0  ;;  %s125_s0 = inlined_call_operand.hbm [shape: f32[8,16], index: 0, kind: input, shape index: {}]   ;;  %s126_s1 = inlined_call_operand.hbm [shape: f32[8,14], index: 1, kind: output, shape index: {}]  }
   0x1   :  { %7 = vsyncpa [#allocation4], 0  ;;  %s89_s6 = smov [#allocation2]   ;;  %s41_s10 = scalar_lea.hbm %s125_s0, 128 }
   0x2   :  { %s14_s7 = sshll.u32 %s89_s6, 4  ;;  %p42_p0 = scmp.ne.s32.totalorder %s125_s0, %s41_s10  ;;  %s15_s7 = int_to_ptr.vmem [resolvable:$true] %s14_s7 }
   0x3   :  { %p45_p1 = scmp.lt.u32.totalorder %s41_s10, %s125_s0 }
   0x5   :  { %p47_p2 = pnand %p45_p1, %p42_p0 }
   0x7   :  { %50 = shalt.err (!%p47_p2)
}
   0x8   :  { %s51_s15 = scalar_lea.vmem %s15_s7, 128  ;;  %p56_p4 = scmp.lt.s32.totalorder %s15_s7, %s15_s7 }
   0x9   :  { %p52_p3 = scmp.ne.s32.totalorder %s15_s7, %s51_s15  ;;  %p57_p5 = scmp.lt.s32.totalorder %s51_s15, %s51_s15 }
   0xb   :  { %p58_p6 = por %p57_p5, %p56_p4 }
   0xd   :  { %p59_p7 = pnand %p58_p6, %p52_p3 }
   0xf   :  { %62 = shalt.err (!%p59_p7)
}
  0x10   :  { %17 = dma.hbm_to_vmem [thread:$0]  %s125_s0, 128, %s15_s7, [#allocation3]  }
  0x11   :  { %85 = dma.done.wait [#allocation3], 128  }
  0x12   :  { %86 = vsyncadd [#allocation3], 4294967168  ;;  %s90_s18 = smov [#allocation5]   ;;  %vm22_vm0 = vcmask 113664   ;;  %v21_v0 = vld [vmem:[#allocation2] sm:$0xff] }
  0x13   :  { %s30_s19 = sshll.u32 %s90_s18, 4  ;;  %23 = vst.msk [vmem:[#allocation5] sm:$0xff] %vm22_vm0, %v21_v0  ;;  %s31_s19 = int_to_ptr.vmem [resolvable:$true] %s30_s19 }
  0x14   :  { %s63_s20 = scalar_lea.vmem %s31_s19, 128  ;;  %p68_p9 = scmp.lt.s32.totalorder %s31_s19, %s31_s19 }
  0x15   :  { %p64_p8 = scmp.ne.s32.totalorder %s31_s19, %s63_s20  ;;  %p69_p10 = scmp.lt.s32.totalorder %s63_s20, %s63_s20 }
  0x17   :  { %p70_p11 = por %p69_p10, %p68_p9 }
  0x19   :  { %p71_p12 = pnand %p70_p11, %p64_p8 }
  0x1b   :  { %74 = shalt.err (!%p71_p12)
}
  0x1c   :  { %s75_s23 = scalar_lea.hbm %s126_s1, 128 }
  0x1d   :  { %p76_p13 = scmp.ne.s32.totalorder %s126_s1, %s75_s23  ;;  %p79_p0 = scmp.lt.u32.totalorder %s75_s23, %s126_s1 }
  0x1f   :  { %p81_p1 = pnand %p79_p0, %p76_p13 }
  0x21   :  { %84 = shalt.err (!%p81_p1)
}
  0x22   :  { %33 = dma.vmem_to_hbm [thread:$0]  %s31_s19, 128, %s126_s1, [#allocation4]  }
  0x23   :  { %87 = dma.done.wait [#allocation4], 128  }
  0x24   :  { %88 = vsyncadd [#allocation4], 4294967168 }
  0x25   :  { %37 = vsyncpa [#allocation3], 1 }
  0x26   :  { %38 = vsyncpa [#allocation4], 1 }

</bundles_post_ra>
